<compile_context>
chip_gen: v7x
topology: tpu7x:2x2x1
jax: 0.10.0
libtpu: 0.0.40
codegen_flags: <defaults>
</compile_context>

<pallas_src>
import functools

import jax
import jax.numpy as jnp
from jax.experimental import pallas as pl
from jax.experimental.pallas import tpu as pltpu


def _round_up(a: int, b: int) -> int:
    return ((a + b - 1) // b) * b


def _pick_tile(size: int, unit: int, max_single: int, candidates) -> int:
    """Pick a tile size (multiple of `unit`).

    If the whole (padded) extent fits in one tile of at most `max_single`, use
    a single full tile (minimal padding, fewest grid steps). Otherwise choose
    the candidate minimizing padding waste (ties -> larger tile).
    """
    full = _round_up(size, unit)
    if full <= max_single:
        return full
    best_t, best_w = None, None
    for t in candidates:                        # descending
        w = _round_up(size, t) - size
        if best_w is None or w < best_w:
            best_t, best_w = t, w
    return best_t


def _arlinear_kernel(j_ids_ref, k_ids_ref, first_ref, last_ref,
                     x_ref, w_ref, *rest, has_bias, has_acc):
    del j_ids_ref, k_ids_ref                    # only used by the index_maps
    rest = list(rest)
    b_ref = rest.pop(0) if has_bias else None
    o_ref = rest.pop(0)
    # f32 outputs accumulate straight into the resident output block; only
    # narrower output dtypes need a separate f32 scratch accumulator.
    acc_ref = rest.pop(0) if has_acc else o_ref

    s = pl.program_id(1)                        # flattened (j, k)-pair index

    @pl.when(first_ref[s] != 0)                 # first K step of this column tile
    def _init():
        acc_ref[...] = jnp.zeros_like(acc_ref)

    # Weight is pre-masked/pre-padded in the wrapper: plain dense MXU matmul.
    acc_ref[...] += jnp.dot(x_ref[...], w_ref[...],
                            preferred_element_type=jnp.float32)

    if has_bias or has_acc:
        @pl.when(last_ref[s] != 0)              # last K step: bias + cast
        def _epilogue():
            if has_acc:
                acc = acc_ref[...]
                if has_bias:
                    acc = acc + b_ref[...]      # f32 bias onto f32 accumulator
                o_ref[...] = acc.astype(o_ref.dtype)
            else:                               # f32 output already in place
                o_ref[...] = o_ref[...] + b_ref[...]


def arlinear_forward(x, weight, bias=None, *, compute_dtype=jnp.bfloat16,
                     tm=None, tn=None, tk=None):
    """Pallas ARLinear forward: x @ tril(weight, -1) (+ bias).

    compute_dtype: dtype of the MXU operands (x and the masked weight). bf16
      is the native MXU dtype on all TPU generations; float32 keeps full-width
      operands (XLA default-precision f32 matmul emulation, ~3x MXU cost).
    """
    in_size, out_size = weight.shape
    assert x.shape[-1] == in_size, (x.shape, weight.shape)
    lead_shape = x.shape[:-1]
    x2d = x.reshape(-1, in_size)
    M = x2d.shape[0]
    out_dtype = x.dtype
    compute_dtype = jnp.dtype(compute_dtype)
    has_bias = bias is not None
    has_acc = jnp.dtype(out_dtype) != jnp.dtype(jnp.float32)

    # Tile selection: TM only needs sublane alignment (16 covers bf16 packing);
    # TK/TN stay lane-aligned multiples of 128 and, when multi-tile, >= 256 for
    # the 256x256 MXU on v6e/v7x.
    TM = tm if tm is not None else _pick_tile(max(M, 1), 16, 512,
                                              (512, 384, 256, 128))
    TK = tk if tk is not None else _pick_tile(in_size, 128, 1024,
                                              (1024, 768, 512, 384, 256))
    TN = tn if tn is not None else _pick_tile(out_size, 128, 1024,
                                              (512, 384, 256))

    M_pad = _round_up(M, TM)
    K_pad = _round_up(in_size, TK)
    N_pad = _round_up(out_size, TN)
    NI, NJ, NK = M_pad // TM, N_pad // TN, K_pad // TK

    # Pre-mask + pad the weight once (O(K*N) elementwise, negligible vs the
    # O(M*K*N) matmul; under jit it is hoisted out of the hot loop — callers
    # that reuse the weight can also precompute tril themselves). Zero padding
    # never changes the result; padded rows/cols are sliced off below.
    xp = jnp.pad(x2d.astype(compute_dtype),
                 ((0, M_pad - M), (0, K_pad - in_size)))
    wp = jnp.pad(jnp.tril(weight, -1).astype(compute_dtype),
                 ((0, K_pad - in_size), (0, N_pad - out_size)))

    # Enumerate only the (j, k) weight tiles that can touch the strictly-lower
    # triangle: tile (k, j) is all-zero unless k*TK + TK - 1 > j*TN. Each
    # column-tile group keeps at least one step (clamped to the last K tile,
    # which is all-zero for fully-above-diagonal columns) so its output
    # (bias or zeros) is still written.
    j_ids, k_ids, firsts, lasts = [], [], [], []
    for j in range(NJ):
        k0 = min((j * TN + 1) // TK, NK - 1)
        for t, k in enumerate(range(k0, NK)):
            j_ids.append(j)
            k_ids.append(k)
            firsts.append(1 if t == 0 else 0)
            lasts.append(1 if k == NK - 1 else 0)
    NS = len(j_ids)

    j_ids = jnp.asarray(j_ids, dtype=jnp.int32)
    k_ids = jnp.asarray(k_ids, dtype=jnp.int32)
    firsts = jnp.asarray(firsts, dtype=jnp.int32)
    lasts = jnp.asarray(lasts, dtype=jnp.int32)

    # index_maps receive (i, s, *scalar_prefetch_refs) and return BLOCK indices.
    x_map = lambda i, s, jid, kid, fst, lst: (i, kid[s])
    w_map = lambda i, s, jid, kid, fst, lst: (kid[s], jid[s])
    o_map = lambda i, s, jid, kid, fst, lst: (i, jid[s])
    b_map = lambda i, s, jid, kid, fst, lst: (0, jid[s])

    in_specs = [pl.BlockSpec((TM, TK), x_map),
                pl.BlockSpec((TK, TN), w_map)]
    operands = [xp, wp]
    if has_bias:
        bp = jnp.pad(bias.astype(jnp.float32), (0, N_pad - out_size))
        operands.append(bp.reshape(1, N_pad))
        in_specs.append(pl.BlockSpec((1, TN), b_map))

    scratch_shapes = [pltpu.VMEM((TM, TN), jnp.float32)] if has_acc else []

    # Explicit VMEM budget: double-buffered x / w / out (+ acc + bias), capped
    # at 48 MiB so it always fits v7x's 64 MiB VMEM (v5e/v6e have 128 MiB).
    cb = compute_dtype.itemsize
    ob = jnp.dtype(out_dtype).itemsize
    working = (2 * TM * TK * cb + 2 * TK * TN * cb + 2 * TM * TN * ob
               + (TM * TN * 4 if has_acc else 0)
               + (2 * TN * 4 if has_bias else 0))
    vmem_limit = int(min(48 * 1024 * 1024, max(32 * 1024 * 1024, 2 * working)))

    kernel = functools.partial(_arlinear_kernel, has_bias=has_bias,
                               has_acc=has_acc)

    out_padded = pl.pallas_call(
        kernel,
        out_shape=jax.ShapeDtypeStruct((M_pad, N_pad), out_dtype),
        grid_spec=pltpu.PrefetchScalarGridSpec(
            num_scalar_prefetch=4,
            grid=(NI, NS),
            in_specs=in_specs,
            out_specs=pl.BlockSpec((TM, TN), o_map),
            scratch_shapes=scratch_shapes,
        ),
        compiler_params=pltpu.CompilerParams(
            # M tiles are independent; the pair axis revisits output blocks
            # only when NK > 1, otherwise it is parallel too (keeps both v7x
            # TensorCores busy even when M collapses to a single tile).
            dimension_semantics=("parallel",
                                 "parallel" if NK == 1 else "arbitrary"),
            vmem_limit_bytes=vmem_limit,
        ),
    )(j_ids, k_ids, firsts, lasts, *operands)

    out2d = out_padded[:M, :out_size]
    return out2d.reshape(*lead_shape, out_size)


def arlinear_reference(x, weight, bias=None):
    """Pure-JAX reference matching the PyTorch forward (high precision)."""
    w_masked = jnp.tril(weight, -1).astype(jnp.float32)
    out = jnp.einsum("...k,kn->...n", x.astype(jnp.float32), w_masked,
                     precision=jax.lax.Precision.HIGHEST)
    if bias is not None:
        out = out + bias.astype(jnp.float32)
    return out.astype(x.dtype)


def _check(name, out, ref, tol):
    assert out.shape == ref.shape, (name, out.shape, ref.shape)
    err = float(jnp.max(jnp.abs(out.astype(jnp.float32)
                                - ref.astype(jnp.float32))))
    assert err <= tol, f"{name}: max abs err {err} > {tol}"


if __name__ == "__main__":
    def make_layer(key, in_size, out_size, with_bias=True):
        kw, kb = jax.random.split(key)
        stdv = 2.0 / in_size
        w = stdv * jax.random.normal(kw, (in_size, out_size), jnp.float32)
        b = (jax.random.uniform(kb, (out_size,), jnp.float32, -stdv, stdv)
             if with_bias else None)
        return w, b

    # 1) Small shape typical of the module; default bf16 compute path.
    k_x1, k_l1 = jax.random.split(jax.random.PRNGKey(0))
    w1, b1 = make_layer(k_l1, 32, 32)
    x1 = jax.random.normal(k_x1, (2, 4, 32), jnp.float32)
    out1 = jax.block_until_ready(arlinear_forward(x1, w1, b1))
    _check("small+bias (bf16)", out1, arlinear_reference(x1, w1, b1), 2e-2)

    # 2) Mid-size layer, f32 compute path (tight tolerance); single big tiles.
    k_x2, k_w2, k_b2 = jax.random.split(jax.random.PRNGKey(1), 3)
    stdv2 = 2.0 / 640
    w2 = stdv2 * jax.random.normal(k_w2, (640, 600), jnp.float32)
    b2 = jax.random.uniform(k_b2, (600,), jnp.float32, -stdv2, stdv2)
    x2 = jax.random.normal(k_x2, (3, 90, 640), jnp.float32)   # M=270 -> TM=272
    out2 = jax.block_until_ready(
        arlinear_forward(x2, w2, b2, compute_dtype=jnp.float32))
    _check("mid+bias (f32)", out2, arlinear_reference(x2, w2, b2), 3e-3)

    # 3) Same layer, no bias, bf16 compute path (no bias operand passed).
    out3 = jax.block_until_ready(arlinear_forward(x2, w2, None))
    _check("mid-nobias (bf16)", out3, arlinear_reference(x2, w2, None), 5e-3)

    # 4) Square layer with NK=2, NJ=3: multi-step accumulation groups plus a
    #    skipped above-diagonal weight tile (the flattened-pair grid).
    k_x4, k_l4 = jax.random.split(jax.random.PRNGKey(2))
    w4, b4 = make_layer(k_l4, 1300, 1300)
    x4 = jax.random.normal(k_x4, (64, 1300), jnp.float32)
    out4 = jax.block_until_ready(arlinear_forward(x4, w4, b4))
    _check("square NK=2 (bf16)", out4, arlinear_reference(x4, w4, b4), 3e-3)

    # 5) Wide layer (out >> in): column tiles with no lower-triangular entries
    #    must still write bias; also exercises multiple M tiles (M=520).
    k_x5, k_l5 = jax.random.split(jax.random.PRNGKey(3))
    w5, b5 = make_layer(k_l5, 96, 1400)
    x5 = jax.random.normal(k_x5, (520, 96), jnp.float32)
    out5 = jax.block_until_ready(arlinear_forward(x5, w5, b5))
    _check("wide+bias (bf16)", out5, arlinear_reference(x5, w5, b5), 5e-3)

    # 6) bf16 activations end-to-end (exercises the f32 scratch-accumulator
    #    path used for sub-f32 output dtypes).
    k_x6, k_l6 = jax.random.split(jax.random.PRNGKey(4))
    w6, b6 = make_layer(k_l6, 256, 256)
    x6 = jax.random.normal(k_x6, (16, 256), jnp.float32).astype(jnp.bfloat16)
    out6 = jax.block_until_ready(arlinear_forward(x6, w6, b6))
    _check("bf16-act+bias", out6, arlinear_reference(x6, w6, b6), 5e-3)

    print("KERNEL_OK")
</pallas_src>

<mosaic_0001>
module attributes {stable_mosaic.version = 11 : i64} {
  func.func @_arlinear_kernel(%arg0: i32, %arg1: i32, %arg2: memref<1xi32, #tpu.memory_space<smem>>, %arg3: memref<1xi32, #tpu.memory_space<smem>>, %arg4: memref<1xi32, #tpu.memory_space<smem>>, %arg5: memref<1xi32, #tpu.memory_space<smem>>, %arg6: memref<16x128xbf16, #tpu.memory_space<vmem>>, %arg7: memref<128x128xbf16, #tpu.memory_space<vmem>>, %arg8: memref<1x128xf32, #tpu.memory_space<vmem>>, %arg9: memref<16x128xf32, #tpu.memory_space<vmem>>) attributes {dimension_semantics = [#tpu.dimension_semantics<parallel>, #tpu.dimension_semantics<parallel>], iteration_bounds = array<i64: 1, 1>, scalar_prefetch = 4 : i64, scratch_operands = 0 : i64, tpu.core_type = #tpu.core_type<tc>, window_params = [{transform_indices = @transform_0, window_bounds = array<i64: 16, 128>}, {transform_indices = @transform_1, window_bounds = array<i64: 128, 128>}, {transform_indices = @transform_2, window_bounds = array<i64: 1, 128>}, {transform_indices = @transform_3, window_bounds = array<i64: 16, 128>}]} {
    %0 = arith.index_cast %arg1 : i32 to index
    %1 = memref.load %arg4[%0] : memref<1xi32, #tpu.memory_space<smem>>
    %c0_i32 = arith.constant 0 : i32
    %2 = arith.cmpi ne, %1, %c0_i32 : i32
    %3 = arith.extui %2 : i1 to i32
    %c0_i32_0 = arith.constant 0 : i32
    %4 = arith.cmpi ne, %3, %c0_i32_0 : i32
    scf.if %4 {
      %cst_10 = arith.constant 0.000000e+00 : f32
      %16 = vector.broadcast %cst_10 : f32 to vector<16x128xf32>
      %c0_11 = arith.constant 0 : index
      %c0_12 = arith.constant 0 : index
      %17 = vector.load %arg9[%c0_11, %c0_12] : memref<16x128xf32, #tpu.memory_space<vmem>>, vector<16x128xf32>
      tpu.vector_store %arg9[%c0_11, %c0_12], %16 {strides = array<i32>} : memref<16x128xf32, #tpu.memory_space<vmem>>, vector<16x128xf32>,
    } else {
    }
    %c0 = arith.constant 0 : index
    %c0_1 = arith.constant 0 : index
    %5 = vector.load %arg9[%c0, %c0_1] : memref<16x128xf32, #tpu.memory_space<vmem>>, vector<16x128xf32>
    %c0_2 = arith.constant 0 : index
    %c0_3 = arith.constant 0 : index
    %6 = vector.load %arg6[%c0_2, %c0_3] : memref<16x128xbf16, #tpu.memory_space<vmem>>, vector<16x128xbf16>
    %c0_4 = arith.constant 0 : index
    %c0_5 = arith.constant 0 : index
    %7 = vector.load %arg7[%c0_4, %c0_5] : memref<128x128xbf16, #tpu.memory_space<vmem>>, vector<128x128xbf16>
    %cst = arith.constant dense<0.000000e+00> : vector<16x128xf32>
    %8 = tpu.matmul %6, %7, %cst {dimension_numbers = #tpu.dot_dimension_numbers<[1], [0], [0], [1], [0, 0, 1, 1], [], []>} : vector<16x128xbf16>, vector<128x128xbf16>, vector<16x128xf32> -> vector<16x128xf32>
    %9 = arith.addf %5, %8 : vector<16x128xf32>
    %c0_6 = arith.constant 0 : index
    %c0_7 = arith.constant 0 : index
    %10 = vector.load %arg9[%c0_6, %c0_7] : memref<16x128xf32, #tpu.memory_space<vmem>>, vector<16x128xf32>
    tpu.vector_store %arg9[%c0_6, %c0_7], %9 {strides = array<i32>} : memref<16x128xf32, #tpu.memory_space<vmem>>, vector<16x128xf32>,
    %11 = arith.index_cast %arg1 : i32 to index
    %12 = memref.load %arg5[%11] : memref<1xi32, #tpu.memory_space<smem>>
    %c0_i32_8 = arith.constant 0 : i32
    %13 = arith.cmpi ne, %12, %c0_i32_8 : i32
    %14 = arith.extui %13 : i1 to i32
    %c0_i32_9 = arith.constant 0 : i32
    %15 = arith.cmpi ne, %14, %c0_i32_9 : i32
    scf.if %15 {
      %c0_10 = arith.constant 0 : index
      %c0_11 = arith.constant 0 : index
      %16 = vector.load %arg9[%c0_10, %c0_11] : memref<16x128xf32, #tpu.memory_space<vmem>>, vector<16x128xf32>
      %c0_12 = arith.constant 0 : index
      %c0_13 = arith.constant 0 : index
      %17 = vector.load %arg8[%c0_12, %c0_13] : memref<1x128xf32, #tpu.memory_space<vmem>>, vector<1x128xf32>
      %18 = vector.broadcast %17 : vector<1x128xf32> to vector<16x128xf32>
      %19 = arith.addf %16, %18 : vector<16x128xf32>
      %c0_14 = arith.constant 0 : index
      %c0_15 = arith.constant 0 : index
      %20 = vector.load %arg9[%c0_14, %c0_15] : memref<16x128xf32, #tpu.memory_space<vmem>>, vector<16x128xf32>
      tpu.vector_store %arg9[%c0_14, %c0_15], %19 {strides = array<i32>} : memref<16x128xf32, #tpu.memory_space<vmem>>, vector<16x128xf32>,
    } else {
    }
    return
  }
  func.func @transform_0(%arg0: i32, %arg1: i32, %arg2: memref<1xi32, #tpu.memory_space<smem>>, %arg3: memref<1xi32, #tpu.memory_space<smem>>, %arg4: memref<1xi32, #tpu.memory_space<smem>>, %arg5: memref<1xi32, #tpu.memory_space<smem>>) -> (i32, i32) {
    %0 = arith.index_cast %arg1 : i32 to index
    %1 = memref.load %arg3[%0] : memref<1xi32, #tpu.memory_space<smem>>
    %c0_i32 = arith.constant 0 : i32
    return %arg0, %1 : i32, i32
  }
  func.func @transform_1(%arg0: i32, %arg1: i32, %arg2: memref<1xi32, #tpu.memory_space<smem>>, %arg3: memref<1xi32, #tpu.memory_space<smem>>, %arg4: memref<1xi32, #tpu.memory_space<smem>>, %arg5: memref<1xi32, #tpu.memory_space<smem>>) -> (i32, i32) {
    %0 = arith.index_cast %arg1 : i32 to index
    %1 = memref.load %arg3[%0] : memref<1xi32, #tpu.memory_space<smem>>
    %2 = arith.index_cast %arg1 : i32 to index
    %3 = memref.load %arg2[%2] : memref<1xi32, #tpu.memory_space<smem>>
    %c0_i32 = arith.constant 0 : i32
    return %1, %3 : i32, i32
  }
  func.func @transform_2(%arg0: i32, %arg1: i32, %arg2: memref<1xi32, #tpu.memory_space<smem>>, %arg3: memref<1xi32, #tpu.memory_space<smem>>, %arg4: memref<1xi32, #tpu.memory_space<smem>>, %arg5: memref<1xi32, #tpu.memory_space<smem>>) -> (i32, i32) {
    %0 = arith.index_cast %arg1 : i32 to index
    %1 = memref.load %arg2[%0] : memref<1xi32, #tpu.memory_space<smem>>
    %c0_i32 = arith.constant 0 : i32
    %c0_i32_0 = arith.constant 0 : i32
    return %c0_i32, %1 : i32, i32
  }
  func.func @transform_3(%arg0: i32, %arg1: i32, %arg2: memref<1xi32, #tpu.memory_space<smem>>, %arg3: memref<1xi32, #tpu.memory_space<smem>>, %arg4: memref<1xi32, #tpu.memory_space<smem>>, %arg5: memref<1xi32, #tpu.memory_space<smem>>) -> (i32, i32) {
    %0 = arith.index_cast %arg1 : i32 to index
    %1 = memref.load %arg2[%0] : memref<1xi32, #tpu.memory_space<smem>>
    %c0_i32 = arith.constant 0 : i32
    return %arg0, %1 : i32, i32
  }
}

</mosaic_0001>

<bundles_post_ra>
// kernel: tpu_custom_call.1
= control target key start
LH: loop header
LB: loop body
LE: loop exit
PB: predicated region body
PF: predicated region fallthrough
CT: control target
= control target key end

     0   :  { %s475_s0 = inlined_call_operand.<no memory space> [shape: s32[1], index: 0, kind: input, shape index: {}]   ;;  %s476_s1 = inlined_call_operand.<no memory space> [shape: s32[1], index: 1, kind: input, shape index: {}]   ;;  %s477_s2 = inlined_call_operand.<no memory space> [shape: s32[1], index: 2, kind: input, shape index: {}]   ;;  %s478_s3 = inlined_call_operand.<no memory space> [shape: s32[1], index: 3, kind: input, shape index: {}]   ;;  %s479_s4 = inlined_call_operand.vmem [shape: bf16[16,128], index: 4, kind: input, shape index: {}]   ;;  %s480_s5 = inlined_call_operand.hbm [shape: bf16[128,128], index: 5, kind: input, shape index: {}]   ;;  %s481_s6 = inlined_call_operand.vmem [shape: f32[1,128], index: 6, kind: input, shape index: {}]   ;;  %s482_s7 = inlined_call_operand.hbm [shape: f32[16,128], index: 7, kind: output, shape index: {}]  }
   0x1   :  { %12 = sst [smem:[#allocation3]] %s475_s0 }
   0x2   :  { %15 = sst [smem:[#allocation6]] %s478_s3 }
   0x3   :  { %16 = vsyncpa [#allocation8], 0 }
   0x4   :  { %17 = vsyncpa [#allocation9], 0  ;;  %s29_s28 = sld [smem:[#allocation3]]  ;;  %s258_s8 = sshll.u32 %s476_s1, 4 }
   0x5   :  { %s373_s9 = smov [#allocation7]   ;;  %s323_s17 = scalar_lea.hbm %s480_s5, 1024 }
   0x6   :  { %s37_s10 = sshll.u32 %s373_s9, 4  ;;  %s38_s10 = int_to_ptr.vmem [resolvable:$true] %s37_s10 }
   0xa   :  { %s34_s11 = sadd.s32 %s258_s8, %s29_s28 }
   0xb   :  { %s259_s12 = sshll.u32 %s34_s11, 6 }
   0xc   :  { %s36_s0 = scalar_lea.hbm %s480_s5, %s259_s12 }
   0xd   :  { %s321_s15 = scalar_lea.hbm %s36_s0, 1024  ;;  %p324_p1 = scmp.lt.u32.totalorder %s36_s0, %s480_s5 }
   0xe   :  { %p322_p0 = scmp.ne.s32.totalorder %s36_s0, %s321_s15  ;;  %p325_p2 = scmp.lt.u32.totalorder %s323_s17, %s321_s15 }
   0xf   :  { %p327_p4 = scmp.lt.u32.totalorder %s321_s15, %s36_s0 }
  0x10   :  { %p326_p3 = por %p325_p2, %p324_p1 }
  0x12   :  { %p328_p5 = por %p327_p4, %p326_p3 }
  0x14   :  { %p329_p6 = pnand %p328_p5, %p322_p0 }
  0x16   :  { %332 = shalt.err (!%p329_p6)
}
  0x17   :  { %s333_s20 = scalar_lea.vmem %s38_s10, 1024  ;;  %p338_p8 = scmp.lt.s32.totalorder %s38_s10, %s38_s10 }
  0x18   :  { %p334_p7 = scmp.ne.s32.totalorder %s38_s10, %s333_s20  ;;  %p339_p9 = scmp.lt.s32.totalorder %s333_s20, %s333_s20 }
  0x1a   :  { %p340_p10 = por %p339_p9, %p338_p8 }
  0x1c   :  { %p341_p11 = pnand %p340_p10, %p334_p7 }
  0x1e   :  { %344 = shalt.err (!%p341_p11)
}
  0x1f   :  { %s374_s21 = smov 64   ;;  %s375_s22 = smov 4  }
  0x20   :  { %43 = dma.hbm_to_vmem [thread:$0]  %s36_s0, 1024, %s38_s10, [#allocation8], %s374_s21, %s374_s21, %s375_s22  }
  0x21   :  { %369 = dma.done.wait [#allocation8], 1024  }
  0x22   :  { %370 = vsyncadd [#allocation8], 4294966272  ;;  %p64_p12 = scmp.lt.s32.totalorder %s476_s1, 0  ;;  %s72_s24 = sld [smem:[#allocation3]] }
  0x23   :  { %p261_p0 = scmp.eq.s32.totalorder %s477_s2, 0 }
  0x24   :  { %s484_s1 = smov (!%p64_p12, %s476_s1), 0  ;;  %v376_v0 = vmov (!%p261_p0), 0.0  }
  0x25   :  { %s260_s27 = sshll.u32 %s484_s1, 2  ;;  %83 = sbr.rel (%p261_p0) target bundleno = 44 (0x2c), region = 21  ;;  %84 = vst [vmem:[#allocation10] sm:$0xff] (!%p261_p0), %v376_v0  ;;  %85 = vst [vmem:[#allocation10 + $0x8] sm:$0xff] (!%p261_p0), %v376_v0 }
  0x26   :  { %s449_s30 = scalar_lea.vmem %s479_s4, %s260_s27 }
  0x28   :  { %p73_p13 = scmp.lt.s32.totalorder %s72_s24, 0 }
  0x2a   :  { %s486_s24 = smov (!%p73_p13, %s72_s24), 0 }
  0x2b   :  { %s75_s10 = scalar_lea.vmem %s481_s6, %s486_s24 }
  0x2c PF:  { %v312_v1 = vld [vmem:[#allocation7] sm:$0xff]   ;;  %v377_v2 = vmov 0.0   ;;  %v313_v3 = vld [vmem:[#allocation7 + $0x8] sm:$0xff]   ;;  %vm378_vm0 = vmmov 0   ;;  %v314_v4 = vld [vmem:[#allocation7 + $0x10] sm:$0xff]   ;;  %s205_s1 = sld [smem:[#allocation6]] }
  0x2d   :  { %283 = vmatprep.subr.bf16.mxu0 %v377_v2  ;;  %299 = vmatprep.mubr.msk.bf16.mxu0 %vm378_vm0, %v377_v2  ;;  %v315_v5 = vld [vmem:[#allocation7 + $0x18] sm:$0xff]   ;;  %v316_v6 = vld [vmem:[#allocation7 + $0x20] sm:$0xff]   ;;  %v317_v7 = vld [vmem:[#allocation7 + $0x28] sm:$0xff]  }
  0x2e   :  { %284 = vmatpush3.bf16.msra.mxu0 %v312_v1  ;;  %v318_v8 = vld [vmem:[#allocation7 + $0x30] sm:$0xff]   ;;  %v319_v9 = vld [vmem:[#allocation7 + $0x38] sm:$0xff]   ;;  %v320_v10 = vld [vmem:[%s449_s30] sm:$0xff]  }
  0x2f   :  { %285 = vmatprep.subr.bf16.mxu0 %v377_v2  ;;  %v86_v11 = vld [vmem:[#allocation10] sm:$0xff]  ;;  %v87_v13 = vld [vmem:[#allocation10 + $0x8] sm:$0xff] }
  0x32   :  { %286 = vmatpush3.bf16.msra.mxu0 %v313_v3  ;;  %p271_p1 = scmp.eq.s32.totalorder %s205_s1, 0 }
  0x33   :  { %287 = vmatprep.subr.bf16.mxu0 %v377_v2  ;;  %v272_v20 = vld [vmem:[%s75_s10] ss:$0 sm:$0xff] (!%p271_p1) }
  0x36   :  { %288 = vmatpush3.bf16.msra.mxu0 %v314_v4 }
  0x37   :  { %289 = vmatprep.subr.bf16.mxu0 %v377_v2 }
  0x3a   :  { %290 = vmatpush3.bf16.msra.mxu0 %v315_v5 }
  0x3b   :  { %291 = vmatprep.subr.bf16.mxu0 %v377_v2 }
  0x3e   :  { %292 = vmatpush3.bf16.msra.mxu0 %v316_v6 }
  0x3f   :  { %293 = vmatprep.subr.bf16.mxu0 %v377_v2 }
  0x42   :  { %294 = vmatpush3.bf16.msra.mxu0 %v317_v7 }
  0x43   :  { %295 = vmatprep.subr.bf16.mxu0 %v377_v2 }
  0x46   :  { %296 = vmatpush3.bf16.msra.mxu0 %v318_v8 }
  0x47   :  { %297 = vmatprep.subr.bf16.mxu0 %v377_v2 }
  0x4a   :  { %298 = vmatpush3.bf16.msra.mxu0 %v319_v9 }
  0x4d   :  { %300 = vmatmul.mubr.bf16.vlgmr.msra.gmra.mrb[0].mxu0 %v320_v10 }
 0x11f   :  { %209 = sbr.rel (%p271_p1) target bundleno = 304 (0x130), region = 25 }
 0x120   :  { %v194_v12 = vpop.f32.mrb[0].mxu0 }
 0x121   :  { %v201_v14 = vadd.f32 %v194_v12, %v86_v11  ;;  %v301_v15 = vpop.f32.mrb[1].mxu0 }
 0x122   :  { %v197_v16 = vpop.f32.mrb[2].mxu0 }
 0x123   :  { %203 = vst [vmem:[#allocation10] sm:$0xff] %v201_v14  ;;  %v202_v17 = vadd.f32 %v197_v16, %v87_v13  ;;  %v302_v18 = vpop.f32.mrb[3].mxu0 }
 0x125   :  { %204 = vst [vmem:[#allocation10 + $0x8] sm:$0xff] %v202_v17 }
 0x12a   :  { %v210_v19 = vld [vmem:[#allocation10] sm:$0xff] }
 0x12b   :  { %v219_v22 = vadd.f32 %v272_v20, %v210_v19 }
 0x12c   :  { %v211_v21 = vld [vmem:[#allocation10 + $0x8] sm:$0xff] }
 0x12d   :  { %v220_v23 = vadd.f32 %v272_v20, %v211_v21  ;;  %221 = vst [vmem:[#allocation10] sm:$0xff] %v219_v22 }
 0x12f   :  { %222 = vst [vmem:[#allocation10 + $0x8] sm:$0xff] %v220_v23 }
 0x130 PF:  { %s225_s13 = sld [smem:[#allocation3]]  ;;  %s379_s14 = smov [#allocation10]  }
 0x131   :  { %s231_s0 = sshll.u32 %s379_s14, 4  ;;  %s232_s0 = int_to_ptr.vmem [resolvable:$true] %s231_s0 }
 0x132   :  { %s345_s18 = scalar_lea.vmem %s232_s0, 256  ;;  %p350_p3 = scmp.lt.s32.totalorder %s232_s0, %s232_s0 }
 0x133   :  { %p346_p2 = scmp.ne.s32.totalorder %s232_s0, %s345_s18  ;;  %p351_p4 = scmp.lt.s32.totalorder %s345_s18, %s345_s18 }
 0x135   :  { %p352_p5 = por %p351_p4, %p350_p3 }
 0x136   :  { %s273_s15 = sshll.u32 %s225_s13, 7 }
 0x137   :  { %s230_s17 = scalar_lea.hbm %s482_s7, %s273_s15  ;;  %p353_p6 = pnand %p352_p5, %p346_p2 }
 0x139   :  { %356 = shalt.err (!%p353_p6)
}
 0x13a   :  { %s357_s6 = scalar_lea.hbm %s230_s17, 256  ;;  %s359_s21 = scalar_lea.hbm %s482_s7, 256 }
 0x13b   :  { %p358_p7 = scmp.ne.s32.totalorder %s230_s17, %s357_s6  ;;  %p360_p8 = scmp.lt.u32.totalorder %s230_s17, %s482_s7 }
 0x13c   :  { %p361_p9 = scmp.lt.u32.totalorder %s359_s21, %s357_s6  ;;  %p363_p11 = scmp.lt.u32.totalorder %s357_s6, %s230_s17 }
 0x13e   :  { %p362_p10 = por %p361_p9, %p360_p8 }
 0x140   :  { %p364_p12 = por %p363_p11, %p362_p10 }
 0x142   :  { %p365_p13 = pnand %p364_p12, %p358_p7 }
 0x144   :  { %368 = shalt.err (!%p365_p13)
}
 0x145   :  { %s380_s5 = smov 128   ;;  %s381_s24 = smov 8  }
 0x146   :  { %237 = dma.vmem_to_hbm [thread:$0]  %s232_s0, 256, %s230_s17, [#allocation9], %s380_s5, %s380_s5, %s381_s24  }
 0x147   :  { %371 = dma.done.wait [#allocation9], 256  }
 0x148   :  { %372 = vsyncadd [#allocation9], 4294967040 }
 0x149   :  { %241 = vsyncpa [#allocation8], 1 }
 0x14a   :  { %242 = vsyncpa [#allocation9], 1 }

</bundles_post_ra>
